<compile_context>
chip_gen: v7x
topology: tpu7x:2x2x1
jax: 0.10.0
libtpu: 0.0.40
codegen_flags: <defaults>
</compile_context>

<pallas_src>
import math
import functools

import jax
import jax.numpy as jnp
from jax.experimental import pallas as pl
from jax.experimental.pallas import tpu as pltpu


def _ord_attention_kernel(q_ref, wq_ref, bq_ref, k_ref, v_ref,
                          wfc_ref, bfc_ref, gamma_ref, beta_ref,
                          o_ref,
                          qproj_sc, m_sc, l_sc, acc_sc,
                          *, head_num, atten_dim, residual, eps):
    kv = pl.program_id(2)
    nkv = pl.num_programs(2)
    H, A = head_num, atten_dim

    @pl.when(kv == 0)
    def _():
        # Fused full-width Q projection: (TL, D) x (D, H*A) once per query
        # tile (fills the 256-wide MXU).  1/sqrt(A) is folded in here so the
        # score matmul needs no extra scaling.
        xq = q_ref[0].astype(jnp.bfloat16)
        qp = jnp.dot(xq, wq_ref[...], preferred_element_type=jnp.float32)
        qp = (qp + bq_ref[...]) * (1.0 / math.sqrt(A))
        qproj_sc[...] = qp.astype(jnp.bfloat16)
        # Online-softmax running stats, reset once per query tile.
        m_sc[...] = jnp.full(m_sc.shape, -jnp.inf, dtype=m_sc.dtype)
        l_sc[...] = jnp.zeros_like(l_sc)
        acc_sc[...] = jnp.zeros_like(acc_sc)

    k_blk = k_ref[0]          # (TK, H*A) bf16 -- already projected (+bias)
    v_blk = v_ref[0]          # (TK, H*A) bf16

    # Static head loop: every slice below is a compile-time lane offset (h*A).
    for h in range(H):
        sl = slice(h * A, (h + 1) * A)
        hh = slice(h, h + 1)
        qh = qproj_sc[:, sl]                                         # (TL, A)
        s = jax.lax.dot_general(qh, k_blk[:, sl], (((1,), (1,)), ((), ())),
                                preferred_element_type=jnp.float32)  # (TL, TK)
        m_prev = m_sc[:, hh]
        m_new = jnp.maximum(m_prev, jnp.max(s, axis=-1, keepdims=True))
        alpha = jnp.exp(m_prev - m_new)
        p = jnp.exp(s - m_new)              # un-normalized; norm deferred
        l_sc[:, hh] = alpha * l_sc[:, hh] + jnp.sum(p, axis=-1, keepdims=True)
        acc_sc[:, sl] = alpha * acc_sc[:, sl] + jnp.dot(
            p.astype(jnp.bfloat16), v_blk[:, sl],
            preferred_element_type=jnp.float32)                      # (TL, A)
        m_sc[:, hh] = m_new

    @pl.when(kv == nkv - 1)
    def _():
        # Deferred softmax normalization: scale the (TL, A) ctx rows per head
        # with the EUP approximate reciprocal (not the (TL, TK) p tile).
        for h in range(H):
            sl = slice(h * A, (h + 1) * A)
            inv_l = pl.reciprocal(l_sc[:, h:h + 1], approx=True)
            acc_sc[:, sl] = acc_sc[:, sl] * inv_l
        ctx = acc_sc[...].astype(jnp.bfloat16)                       # (TL, H*A)

        # Single fc matmul, contraction dim = H*A (full MXU K fill).
        out = jnp.dot(ctx, wfc_ref[...],
                      preferred_element_type=jnp.float32) + bfc_ref[...]
        # TODO(synk): nn.Dropout is identity in eval mode; training-mode
        # stochastic dropout is not implemented here.
        if residual:
            out = out + q_ref[0].astype(jnp.float32)   # exact f32 residual
        mean = jnp.mean(out, axis=-1, keepdims=True)
        var = jnp.mean(jnp.square(out - mean), axis=-1, keepdims=True)
        normed = (out - mean) * jax.lax.rsqrt(var + eps)
        o_ref[0] = (normed * gamma_ref[...] + beta_ref[...]).astype(o_ref.dtype)


def _vmem_budget_bytes():
    """~85% of physical VMEM, capped at 100 MiB (conservative 64 MiB fallback)."""
    cap = 64 * 1024 * 1024
    try:
        cap = int(pltpu.get_tpu_info().vmem_capacity_bytes)
    except Exception:
        pass
    return min(int(cap * 0.85), 100 * 1024 * 1024)


def _divisor_tiles(n):
    """Candidate tile sizes for an axis of length n, largest first."""
    cands = [t for t in (1024, 512, 256, 128, 64, 32, 16, 8) if t <= n and n % t == 0]
    # TODO(synk): pad + mask ragged sequence lengths instead of falling back
    # to a single full-length tile when L has no power-of-two divisor >= 8.
    return cands or [n]


def _vmem_estimate(tl, tk, d, ha, io_bytes):
    kv_blocks = 2 * 2 * tk * ha * 2                 # K,V blocks, double-buffered bf16
    q_in = 2 * tl * d * io_bytes                    # Q tile, double-buffered
    out = 2 * tl * d * io_bytes                     # output tile, double-buffered
    weights = 2 * 2 * (d * ha + ha * d)             # W_Q + fc bf16, double-buffered
    biases = 4 * 2 * (ha + 3 * d)
    scratch = tl * ha * 2 + tl * ha * 4 + 2 * tl * 128 * 4
    transient = 3 * tl * tk * 4 + 3 * tl * d * 4    # score tile / finalize temps
    return kv_blocks + q_in + out + weights + biases + scratch + transient


def _pick_tiles(L, d, ha, io_bytes, budget):
    tiles = _divisor_tiles(L)
    for tl in tiles:
        for tk in tiles:
            if _vmem_estimate(tl, tk, d, ha, io_bytes) <= budget:
                return tl, tk
    return tiles[-1], tiles[-1]


def ord_attention(Q, K, V, params, *, head_num, atten_dim, residual, eps=1e-5):
    """Pallas TPU implementation of OrdAttention.forward (eval mode)."""
    B, L, D = Q.shape
    H, A = head_num, atten_dim
    HA = H * A
    bf16 = jnp.bfloat16

    wq, bq = params["W_Q"]      # (D, H*A), (1, H*A)
    wk, bk = params["W_K"]
    wv, bv = params["W_V"]
    wfc, bfc = params["fc"]     # (H*A, D), (1, D)
    gamma, beta = params["norm"]

    # K/V projections hoisted out of the query-tile loop: computed exactly
    # once as full-width GEMMs (bf16 MXU operands, f32 accumulation).
    kp = (jnp.einsum("bld,df->blf", K.astype(bf16), wk.astype(bf16),
                     preferred_element_type=jnp.float32) + bk).astype(bf16)
    vp = (jnp.einsum("bld,df->blf", V.astype(bf16), wv.astype(bf16),
                     preferred_element_type=jnp.float32) + bv).astype(bf16)

    budget = _vmem_budget_bytes()
    TL, TK = _pick_tiles(L, D, HA, Q.dtype.itemsize, budget)
    grid = (B, L // TL, L // TK)

    kernel = functools.partial(
        _ord_attention_kernel,
        head_num=H, atten_dim=A, residual=residual, eps=eps)

    q_spec = pl.BlockSpec((1, TL, D), lambda b, i, kv: (b, i, 0))
    kv_spec = pl.BlockSpec((1, TK, HA), lambda b, i, kv: (b, kv, 0))
    wq_spec = pl.BlockSpec((D, HA), lambda b, i, kv: (0, 0))     # resident
    bq_spec = pl.BlockSpec((1, HA), lambda b, i, kv: (0, 0))
    wfc_spec = pl.BlockSpec((HA, D), lambda b, i, kv: (0, 0))    # resident
    dvec_spec = pl.BlockSpec((1, D), lambda b, i, kv: (0, 0))
    out_spec = pl.BlockSpec((1, TL, D), lambda b, i, kv: (b, i, 0))

    return pl.pallas_call(
        kernel,
        out_shape=jax.ShapeDtypeStruct((B, L, D), Q.dtype),
        grid_spec=pltpu.PrefetchScalarGridSpec(
            num_scalar_prefetch=0,
            grid=grid,
            in_specs=[q_spec,
                      wq_spec, bq_spec,
                      kv_spec, kv_spec,
                      wfc_spec, dvec_spec,
                      dvec_spec, dvec_spec],
            out_specs=out_spec,
            scratch_shapes=[
                pltpu.VMEM((TL, HA), bf16),         # fused, scaled Q projection
                pltpu.VMEM((TL, H), jnp.float32),   # running row-max per head
                pltpu.VMEM((TL, H), jnp.float32),   # running denom per head
                pltpu.VMEM((TL, HA), jnp.float32),  # running ctx accumulator
            ]),
        compiler_params=pltpu.CompilerParams(
            dimension_semantics=("parallel", "parallel", "arbitrary"),
            vmem_limit_bytes=budget),
    )(Q, wq.astype(bf16), bq, kp, vp,
      wfc.astype(bf16), bfc, gamma, beta)


def init_params(key, model_dim, atten_dim, head_num):
    """Deterministic parameter init (uniform, PyTorch-Linear-like fan_in bound).

    Linear weights are stored transposed: (in_features, out_features).
    """
    HA = atten_dim * head_num
    keys = jax.random.split(key, 8)

    def linear(kw, kb, fan_in, fan_out):
        bound = 1.0 / math.sqrt(fan_in)
        w = jax.random.uniform(kw, (fan_in, fan_out), jnp.float32, -bound, bound)
        b = jax.random.uniform(kb, (1, fan_out), jnp.float32, -bound, bound)
        return w, b

    return {
        "W_Q": linear(keys[0], keys[1], model_dim, HA),
        "W_K": linear(keys[2], keys[3], model_dim, HA),
        "W_V": linear(keys[4], keys[5], model_dim, HA),
        "fc":  linear(keys[6], keys[7], HA, model_dim),
        "norm": (jnp.ones((1, model_dim), jnp.float32),
                 jnp.zeros((1, model_dim), jnp.float32)),
    }


def _reference(Q, K, V, params, *, head_num, atten_dim, residual, eps=1e-5):
    """Pure-JAX f32 reference mirroring the PyTorch forward (eval mode)."""
    B, L, D = Q.shape
    wq, bq = params["W_Q"]; wk, bk = params["W_K"]; wv, bv = params["W_V"]
    wfc, bfc = params["fc"]; gamma, beta = params["norm"]

    def proj(x, w, b):
        y = x @ w + b
        return y.reshape(B, L, head_num, atten_dim).transpose(0, 2, 1, 3)

    q, k, v = proj(Q, wq, bq), proj(K, wk, bk), proj(V, wv, bv)
    scores = jnp.einsum("bhqd,bhkd->bhqk", q, k) / math.sqrt(atten_dim)
    attn = jax.nn.softmax(scores, axis=-1)
    ctx = jnp.einsum("bhqk,bhkd->bhqd", attn, v)
    ctx = ctx.transpose(0, 2, 1, 3).reshape(B, L, head_num * atten_dim)
    out = ctx @ wfc + bfc
    if residual:
        out = out + Q
    mean = out.mean(-1, keepdims=True)
    var = ((out - mean) ** 2).mean(-1, keepdims=True)
    return (out - mean) * jax.lax.rsqrt(var + eps) * gamma + beta


if __name__ == "__main__":
    # Small shapes: batch=2, seq=8, model_dim=32, heads=4, atten_dim=16.
    B, L, D = 2, 8, 32
    head_num, atten_dim = 4, 16
    residual = True

    key = jax.random.PRNGKey(0)
    k_p, k_q, k_k, k_v = jax.random.split(key, 4)
    params = init_params(k_p, D, atten_dim, head_num)

    Q = jax.random.normal(k_q, (B, L, D), jnp.float32)
    K = jax.random.normal(k_k, (B, L, D), jnp.float32)
    V = jax.random.normal(k_v, (B, L, D), jnp.float32)

    out = ord_attention(Q, K, V, params,
                        head_num=head_num, atten_dim=atten_dim,
                        residual=residual)
    out = jax.block_until_ready(out)

    ref = _reference(Q, K, V, params,
                     head_num=head_num, atten_dim=atten_dim,
                     residual=residual)
    assert out.shape == (B, L, D)
    # Tolerance loosened vs the pure-f32 reference: bf16 MXU operands for all
    # projections/attention matmuls and the approx EUP reciprocal in the
    # softmax denominator introduce ~1e-3 relative error.
    assert jnp.allclose(out, ref, atol=5e-2, rtol=5e-2), (
        float(jnp.max(jnp.abs(out - ref))))

    print("KERNEL_OK")
</pallas_src>

<mosaic_0001>
module attributes {stable_mosaic.version = 11 : i64} {
  func.func @_ord_attention_kernel(%arg0: i32, %arg1: i32, %arg2: i32, %arg3: memref<1x8x32xf32, #tpu.memory_space<vmem>>, %arg4: memref<32x64xbf16, #tpu.memory_space<vmem>>, %arg5: memref<1x64xf32, #tpu.memory_space<vmem>>, %arg6: memref<1x8x64xbf16, #tpu.memory_space<vmem>>, %arg7: memref<1x8x64xbf16, #tpu.memory_space<vmem>>, %arg8: memref<64x32xbf16, #tpu.memory_space<vmem>>, %arg9: memref<1x32xf32, #tpu.memory_space<vmem>>, %arg10: memref<1x32xf32, #tpu.memory_space<vmem>>, %arg11: memref<1x32xf32, #tpu.memory_space<vmem>>, %arg12: memref<1x8x32xf32, #tpu.memory_space<vmem>>, %arg13: memref<8x64xbf16, #tpu.memory_space<vmem>>, %arg14: memref<8x4xf32, #tpu.memory_space<vmem>>, %arg15: memref<8x4xf32, #tpu.memory_space<vmem>>, %arg16: memref<8x64xf32, #tpu.memory_space<vmem>>) attributes {dimension_semantics = [#tpu.dimension_semantics<parallel>, #tpu.dimension_semantics<parallel>, #tpu.dimension_semantics<arbitrary>], iteration_bounds = array<i64: 2, 1, 1>, scalar_prefetch = 0 : i64, scratch_operands = 4 : i64, tpu.core_type = #tpu.core_type<tc>, window_params = [{transform_indices = @transform_0, window_bounds = array<i64: 1, 8, 32>}, {pipeline_mode = #tpu.pipeline_mode<synchronous>, transform_indices = @transform_1, window_bounds = array<i64: 32, 64>}, {pipeline_mode = #tpu.pipeline_mode<synchronous>, transform_indices = @transform_2, window_bounds = array<i64: 1, 64>}, {transform_indices = @transform_3, window_bounds = array<i64: 1, 8, 64>}, {transform_indices = @transform_4, window_bounds = array<i64: 1, 8, 64>}, {pipeline_mode = #tpu.pipeline_mode<synchronous>, transform_indices = @transform_5, window_bounds = array<i64: 64, 32>}, {pipeline_mode = #tpu.pipeline_mode<synchronous>, transform_indices = @transform_6, window_bounds = array<i64: 1, 32>}, {pipeline_mode = #tpu.pipeline_mode<synchronous>, transform_indices = @transform_7, window_bounds = array<i64: 1, 32>}, {pipeline_mode = #tpu.pipeline_mode<synchronous>, transform_indices = @transform_8, window_bounds = array<i64: 1, 32>}, {transform_indices = @transform_9, window_bounds = array<i64: 1, 8, 32>}]} {
    %c0_i32 = arith.constant 0 : i32
    %0 = arith.cmpi eq, %arg2, %c0_i32 : i32
    %1 = arith.extui %0 : i1 to i32
    %c0_i32_0 = arith.constant 0 : i32
    %2 = arith.cmpi ne, %1, %c0_i32_0 : i32
    scf.if %2 {
      %c0_73 = arith.constant 0 : index
      %c0_74 = arith.constant 0 : index
      %c0_75 = arith.constant 0 : index
      %118 = vector.load %arg3[%c0_73, %c0_74, %c0_75] : memref<1x8x32xf32, #tpu.memory_space<vmem>>, vector<1x8x32xf32>
      %119 = vector.shape_cast %118 : vector<1x8x32xf32> to vector<8x32xf32>
      %120 = arith.truncf %119 : vector<8x32xf32> to vector<8x32xbf16>
      %c0_76 = arith.constant 0 : index
      %c0_77 = arith.constant 0 : index
      %121 = vector.load %arg4[%c0_76, %c0_77] : memref<32x64xbf16, #tpu.memory_space<vmem>>, vector<32x64xbf16>
      %cst_78 = arith.constant dense<0.000000e+00> : vector<8x64xf32>
      %122 = tpu.matmul %120, %121, %cst_78 {dimension_numbers = #tpu.dot_dimension_numbers<[1], [0], [0], [1], [0, 0, 1, 1], [], []>} : vector<8x32xbf16>, vector<32x64xbf16>, vector<8x64xf32> -> vector<8x64xf32>
      %c0_79 = arith.constant 0 : index
      %c0_80 = arith.constant 0 : index
      %123 = vector.load %arg5[%c0_79, %c0_80] : memref<1x64xf32, #tpu.memory_space<vmem>>, vector<1x64xf32>
      %124 = vector.broadcast %123 : vector<1x64xf32> to vector<8x64xf32>
      %125 = arith.addf %122, %124 : vector<8x64xf32>
      %cst_81 = arith.constant 2.500000e-01 : f32
      %126 = vector.broadcast %cst_81 : f32 to vector<8x64xf32>
      %127 = arith.mulf %125, %126 : vector<8x64xf32>
      %128 = arith.truncf %127 : vector<8x64xf32> to vector<8x64xbf16>
      %c0_82 = arith.constant 0 : index
      %c0_83 = arith.constant 0 : index
      %129 = vector.load %arg13[%c0_82, %c0_83] : memref<8x64xbf16, #tpu.memory_space<vmem>>, vector<8x64xbf16>
      tpu.vector_store %arg13[%c0_82, %c0_83], %128 {strides = array<i32>} : memref<8x64xbf16, #tpu.memory_space<vmem>>, vector<8x64xbf16>,
      %cst_84 = arith.constant 0xFF800000 : f32
      %130 = vector.broadcast %cst_84 : f32 to vector<8x4xf32>
      %c0_85 = arith.constant 0 : index
      %c0_86 = arith.constant 0 : index
      %131 = vector.load %arg14[%c0_85, %c0_86] : memref<8x4xf32, #tpu.memory_space<vmem>>, vector<8x4xf32>
      tpu.vector_store %arg14[%c0_85, %c0_86], %130 {strides = array<i32>} : memref<8x4xf32, #tpu.memory_space<vmem>>, vector<8x4xf32>,
      %cst_87 = arith.constant 0.000000e+00 : f32
      %132 = vector.broadcast %cst_87 : f32 to vector<8x4xf32>
      %c0_88 = arith.constant 0 : index
      %c0_89 = arith.constant 0 : index
      %133 = vector.load %arg15[%c0_88, %c0_89] : memref<8x4xf32, #tpu.memory_space<vmem>>, vector<8x4xf32>
      tpu.vector_store %arg15[%c0_88, %c0_89], %132 {strides = array<i32>} : memref<8x4xf32, #tpu.memory_space<vmem>>, vector<8x4xf32>,
      %cst_90 = arith.constant 0.000000e+00 : f32
      %134 = vector.broadcast %cst_90 : f32 to vector<8x64xf32>
      %c0_91 = arith.constant 0 : index
      %c0_92 = arith.constant 0 : index
      %135 = vector.load %arg16[%c0_91, %c0_92] : memref<8x64xf32, #tpu.memory_space<vmem>>, vector<8x64xf32>
      tpu.vector_store %arg16[%c0_91, %c0_92], %134 {strides = array<i32>} : memref<8x64xf32, #tpu.memory_space<vmem>>, vector<8x64xf32>,
    } else {
    }
    %c0 = arith.constant 0 : index
    %c0_1 = arith.constant 0 : index
    %c0_2 = arith.constant 0 : index
    %3 = vector.load %arg6[%c0, %c0_1, %c0_2] : memref<1x8x64xbf16, #tpu.memory_space<vmem>>, vector<1x8x64xbf16>
    %4 = vector.shape_cast %3 : vector<1x8x64xbf16> to vector<8x64xbf16>
    %c0_3 = arith.constant 0 : index
    %c0_4 = arith.constant 0 : index
    %c0_5 = arith.constant 0 : index
    %5 = vector.load %arg7[%c0_3, %c0_4, %c0_5] : memref<1x8x64xbf16, #tpu.memory_space<vmem>>, vector<1x8x64xbf16>
    %6 = vector.shape_cast %5 : vector<1x8x64xbf16> to vector<8x64xbf16>
    %c0_6 = arith.constant 0 : index
    %c0_7 = arith.constant 0 : index
    %7 = vector.load %arg13[%c0_6, %c0_7] : memref<8x64xbf16, #tpu.memory_space<vmem>>, vector<8x16xbf16>
    %8 = vector.extract_strided_slice %4 {offsets = [0, 0], sizes = [8, 16], strides = [1, 1]} : vector<8x64xbf16> to vector<8x16xbf16>
    %cst = arith.constant dense<0.000000e+00> : vector<8x8xf32>
    %9 = tpu.matmul %7, %8, %cst {dimension_numbers = #tpu.dot_dimension_numbers<[1], [1], [0], [0], [0, 0, 1, 0], [], []>} : vector<8x16xbf16>, vector<8x16xbf16>, vector<8x8xf32> -> vector<8x8xf32>
    %c0_8 = arith.constant 0 : index
    %c0_9 = arith.constant 0 : index
    %10 = vector.load %arg14[%c0_8, %c0_9] : memref<8x4xf32, #tpu.memory_space<vmem>>, vector<8x1xf32>
    %cst_10 = arith.constant dense<0xFF800000> : vector<8xf32>
    %11 = vector.multi_reduction <maximumf>, %9, %cst_10 [1] : vector<8x8xf32> to vector<8xf32>
    %12 = vector.shape_cast %11 : vector<8xf32> to vector<8x1xf32>
    %13 = arith.maximumf %10, %12 : vector<8x1xf32>
    %14 = arith.subf %10, %13 : vector<8x1xf32>
    %15 = math.exp %14 : vector<8x1xf32>
    %16 = vector.broadcast %13 : vector<8x1xf32> to vector<8x8xf32>
    %17 = arith.subf %9, %16 : vector<8x8xf32>
    %18 = math.exp %17 : vector<8x8xf32>
    %c0_11 = arith.constant 0 : index
    %c0_12 = arith.constant 0 : index
    %19 = vector.load %arg15[%c0_11, %c0_12] : memref<8x4xf32, #tpu.memory_space<vmem>>, vector<8x1xf32>
    %20 = arith.mulf %15, %19 : vector<8x1xf32>
    %cst_13 = arith.constant dense<0.000000e+00> : vector<8xf32>
    %21 = vector.multi_reduction <add>, %18, %cst_13 [1] : vector<8x8xf32> to vector<8xf32>
    %22 = vector.shape_cast %21 : vector<8xf32> to vector<8x1xf32>
    %23 = arith.addf %20, %22 : vector<8x1xf32>
    %c0_14 = arith.constant 0 : index
    %c0_15 = arith.constant 0 : index
    %24 = vector.load %arg15[%c0_14, %c0_15] : memref<8x4xf32, #tpu.memory_space<vmem>>, vector<8x1xf32>
    tpu.vector_store %arg15[%c0_14, %c0_15], %23 {strides = array<i32>} : memref<8x4xf32, #tpu.memory_space<vmem>>, vector<8x1xf32>,
    %c0_16 = arith.constant 0 : index
    %c0_17 = arith.constant 0 : index
    %25 = vector.load %arg16[%c0_16, %c0_17] : memref<8x64xf32, #tpu.memory_space<vmem>>, vector<8x16xf32>
    %26 = vector.broadcast %15 : vector<8x1xf32> to vector<8x16xf32>
    %27 = arith.mulf %26, %25 : vector<8x16xf32>
    %28 = arith.truncf %18 : vector<8x8xf32> to vector<8x8xbf16>
    %29 = vector.extract_strided_slice %6 {offsets = [0, 0], sizes = [8, 16], strides = [1, 1]} : vector<8x64xbf16> to vector<8x16xbf16>
    %cst_18 = arith.constant dense<0.000000e+00> : vector<8x16xf32>
    %30 = tpu.matmul %28, %29, %cst_18 {dimension_numbers = #tpu.dot_dimension_numbers<[1], [0], [0], [1], [0, 0, 1, 1], [], []>} : vector<8x8xbf16>, vector<8x16xbf16>, vector<8x16xf32> -> vector<8x16xf32>
    %31 = arith.addf %27, %30 : vector<8x16xf32>
    %c0_19 = arith.constant 0 : index
    %c0_20 = arith.constant 0 : index
    %32 = vector.load %arg16[%c0_19, %c0_20] : memref<8x64xf32, #tpu.memory_space<vmem>>, vector<8x16xf32>
    tpu.vector_store %arg16[%c0_19, %c0_20], %31 {strides = array<i32>} : memref<8x64xf32, #tpu.memory_space<vmem>>, vector<8x16xf32>,
    %c0_21 = arith.constant 0 : index
    %c0_22 = arith.constant 0 : index
    %33 = vector.load %arg14[%c0_21, %c0_22] : memref<8x4xf32, #tpu.memory_space<vmem>>, vector<8x1xf32>
    tpu.vector_store %arg14[%c0_21, %c0_22], %13 {strides = array<i32>} : memref<8x4xf32, #tpu.memory_space<vmem>>, vector<8x1xf32>,
    %c0_23 = arith.constant 0 : index
    %c16 = arith.constant 16 : index
    %34 = vector.load %arg13[%c0_23, %c16] : memref<8x64xbf16, #tpu.memory_space<vmem>>, vector<8x16xbf16>
    %35 = vector.extract_strided_slice %4 {offsets = [0, 16], sizes = [8, 16], strides = [1, 1]} : vector<8x64xbf16> to vector<8x16xbf16>
    %cst_24 = arith.constant dense<0.000000e+00> : vector<8x8xf32>
    %36 = tpu.matmul %34, %35, %cst_24 {dimension_numbers = #tpu.dot_dimension_numbers<[1], [1], [0], [0], [0, 0, 1, 0], [], []>} : vector<8x16xbf16>, vector<8x16xbf16>, vector<8x8xf32> -> vector<8x8xf32>
    %c0_25 = arith.constant 0 : index
    %c1 = arith.constant 1 : index
    %37 = vector.load %arg14[%c0_25, %c1] : memref<8x4xf32, #tpu.memory_space<vmem>>, vector<8x1xf32>
    %cst_26 = arith.constant dense<0xFF800000> : vector<8xf32>
    %38 = vector.multi_reduction <maximumf>, %36, %cst_26 [1] : vector<8x8xf32> to vector<8xf32>
    %39 = vector.shape_cast %38 : vector<8xf32> to vector<8x1xf32>
    %40 = arith.maximumf %37, %39 : vector<8x1xf32>
    %41 = arith.subf %37, %40 : vector<8x1xf32>
    %42 = math.exp %41 : vector<8x1xf32>
    %43 = vector.broadcast %40 : vector<8x1xf32> to vector<8x8xf32>
    %44 = arith.subf %36, %43 : vector<8x8xf32>
    %45 = math.exp %44 : vector<8x8xf32>
    %c0_27 = arith.constant 0 : index
    %c1_28 = arith.constant 1 : index
    %46 = vector.load %arg15[%c0_27, %c1_28] : memref<8x4xf32, #tpu.memory_space<vmem>>, vector<8x1xf32>
    %47 = arith.mulf %42, %46 : vector<8x1xf32>
    %cst_29 = arith.constant dense<0.000000e+00> : vector<8xf32>
    %48 = vector.multi_reduction <add>, %45, %cst_29 [1] : vector<8x8xf32> to vector<8xf32>
    %49 = vector.shape_cast %48 : vector<8xf32> to vector<8x1xf32>
    %50 = arith.addf %47, %49 : vector<8x1xf32>
    %c0_30 = arith.constant 0 : index
    %c1_31 = arith.constant 1 : index
    %51 = vector.load %arg15[%c0_30, %c1_31] : memref<8x4xf32, #tpu.memory_space<vmem>>, vector<8x1xf32>
    tpu.vector_store %arg15[%c0_30, %c1_31], %50 {strides = array<i32>} : memref<8x4xf32, #tpu.memory_space<vmem>>, vector<8x1xf32>,
    %c0_32 = arith.constant 0 : index
    %c16_33 = arith.constant 16 : index
    %52 = vector.load %arg16[%c0_32, %c16_33] : memref<8x64xf32, #tpu.memory_space<vmem>>, vector<8x16xf32>
    %53 = vector.broadcast %42 : vector<8x1xf32> to vector<8x16xf32>
    %54 = arith.mulf %53, %52 : vector<8x16xf32>
    %55 = arith.truncf %45 : vector<8x8xf32> to vector<8x8xbf16>
    %56 = vector.extract_strided_slice %6 {offsets = [0, 16], sizes = [8, 16], strides = [1, 1]} : vector<8x64xbf16> to vector<8x16xbf16>
    %cst_34 = arith.constant dense<0.000000e+00> : vector<8x16xf32>
    %57 = tpu.matmul %55, %56, %cst_34 {dimension_numbers = #tpu.dot_dimension_numbers<[1], [0], [0], [1], [0, 0, 1, 1], [], []>} : vector<8x8xbf16>, vector<8x16xbf16>, vector<8x16xf32> -> vector<8x16xf32>
    %58 = arith.addf %54, %57 : vector<8x16xf32>
    %c0_35 = arith.constant 0 : index
    %c16_36 = arith.constant 16 : index
    %59 = vector.load %arg16[%c0_35, %c16_36] : memref<8x64xf32, #tpu.memory_space<vmem>>, vector<8x16xf32>
    tpu.vector_store %arg16[%c0_35, %c16_36], %58 {strides = array<i32>} : memref<8x64xf32, #tpu.memory_space<vmem>>, vector<8x16xf32>,
    %c0_37 = arith.constant 0 : index
    %c1_38 = arith.constant 1 : index
    %60 = vector.load %arg14[%c0_37, %c1_38] : memref<8x4xf32, #tpu.memory_space<vmem>>, vector<8x1xf32>
    tpu.vector_store %arg14[%c0_37, %c1_38], %40 {strides = array<i32>} : memref<8x4xf32, #tpu.memory_space<vmem>>, vector<8x1xf32>,
    %c0_39 = arith.constant 0 : index
    %c32 = arith.constant 32 : index
    %61 = vector.load %arg13[%c0_39, %c32] : memref<8x64xbf16, #tpu.memory_space<vmem>>, vector<8x16xbf16>
    %62 = vector.extract_strided_slice %4 {offsets = [0, 32], sizes = [8, 16], strides = [1, 1]} : vector<8x64xbf16> to vector<8x16xbf16>
    %cst_40 = arith.constant dense<0.000000e+00> : vector<8x8xf32>
    %63 = tpu.matmul %61, %62, %cst_40 {dimension_numbers = #tpu.dot_dimension_numbers<[1], [1], [0], [0], [0, 0, 1, 0], [], []>} : vector<8x16xbf16>, vector<8x16xbf16>, vector<8x8xf32> -> vector<8x8xf32>
    %c0_41 = arith.constant 0 : index
    %c2 = arith.constant 2 : index
    %64 = vector.load %arg14[%c0_41, %c2] : memref<8x4xf32, #tpu.memory_space<vmem>>, vector<8x1xf32>
    %cst_42 = arith.constant dense<0xFF800000> : vector<8xf32>
    %65 = vector.multi_reduction <maximumf>, %63, %cst_42 [1] : vector<8x8xf32> to vector<8xf32>
    %66 = vector.shape_cast %65 : vector<8xf32> to vector<8x1xf32>
    %67 = arith.maximumf %64, %66 : vector<8x1xf32>
    %68 = arith.subf %64, %67 : vector<8x1xf32>
    %69 = math.exp %68 : vector<8x1xf32>
    %70 = vector.broadcast %67 : vector<8x1xf32> to vector<8x8xf32>
    %71 = arith.subf %63, %70 : vector<8x8xf32>
    %72 = math.exp %71 : vector<8x8xf32>
    %c0_43 = arith.constant 0 : index
    %c2_44 = arith.constant 2 : index
    %73 = vector.load %arg15[%c0_43, %c2_44] : memref<8x4xf32, #tpu.memory_space<vmem>>, vector<8x1xf32>
    %74 = arith.mulf %69, %73 : vector<8x1xf32>
    %cst_45 = arith.constant dense<0.000000e+00> : vector<8xf32>
    %75 = vector.multi_reduction <add>, %72, %cst_45 [1] : vector<8x8xf32> to vector<8xf32>
    %76 = vector.shape_cast %75 : vector<8xf32> to vector<8x1xf32>
    %77 = arith.addf %74, %76 : vector<8x1xf32>
    %c0_46 = arith.constant 0 : index
    %c2_47 = arith.constant 2 : index
    %78 = vector.load %arg15[%c0_46, %c2_47] : memref<8x4xf32, #tpu.memory_space<vmem>>, vector<8x1xf32>
    tpu.vector_store %arg15[%c0_46, %c2_47], %77 {strides = array<i32>} : memref<8x4xf32, #tpu.memory_space<vmem>>, vector<8x1xf32>,
    %c0_48 = arith.constant 0 : index
    %c32_49 = arith.constant 32 : index
    %79 = vector.load %arg16[%c0_48, %c32_49] : memref<8x64xf32, #tpu.memory_space<vmem>>, vector<8x16xf32>
    %80 = vector.broadcast %69 : vector<8x1xf32> to vector<8x16xf32>
    %81 = arith.mulf %80, %79 : vector<8x16xf32>
    %82 = arith.truncf %72 : vector<8x8xf32> to vector<8x8xbf16>
    %83 = vector.extract_strided_slice %6 {offsets = [0, 32], sizes = [8, 16], strides = [1, 1]} : vector<8x64xbf16> to vector<8x16xbf16>
    %cst_50 = arith.constant dense<0.000000e+00> : vector<8x16xf32>
    %84 = tpu.matmul %82, %83, %cst_50 {dimension_numbers = #tpu.dot_dimension_numbers<[1], [0], [0], [1], [0, 0, 1, 1], [], []>} : vector<8x8xbf16>, vector<8x16xbf16>, vector<8x16xf32> -> vector<8x16xf32>
    %85 = arith.addf %81, %84 : vector<8x16xf32>
    %c0_51 = arith.constant 0 : index
    %c32_52 = arith.constant 32 : index
    %86 = vector.load %arg16[%c0_51, %c32_52] : memref<8x64xf32, #tpu.memory_space<vmem>>, vector<8x16xf32>
    tpu.vector_store %arg16[%c0_51, %c32_52], %85 {strides = array<i32>} : memref<8x64xf32, #tpu.memory_space<vmem>>, vector<8x16xf32>,
    %c0_53 = arith.constant 0 : index
    %c2_54 = arith.constant 2 : index
    %87 = vector.load %arg14[%c0_53, %c2_54] : memref<8x4xf32, #tpu.memory_space<vmem>>, vector<8x1xf32>
    tpu.vector_store %arg14[%c0_53, %c2_54], %67 {strides = array<i32>} : memref<8x4xf32, #tpu.memory_space<vmem>>, vector<8x1xf32>,
    %c0_55 = arith.constant 0 : index
    %c48 = arith.constant 48 : index
    %88 = vector.load %arg13[%c0_55, %c48] : memref<8x64xbf16, #tpu.memory_space<vmem>>, vector<8x16xbf16>
    %89 = vector.extract_strided_slice %4 {offsets = [0, 48], sizes = [8, 16], strides = [1, 1]} : vector<8x64xbf16> to vector<8x16xbf16>
    %cst_56 = arith.constant dense<0.000000e+00> : vector<8x8xf32>
    %90 = tpu.matmul %88, %89, %cst_56 {dimension_numbers = #tpu.dot_dimension_numbers<[1], [1], [0], [0], [0, 0, 1, 0], [], []>} : vector<8x16xbf16>, vector<8x16xbf16>, vector<8x8xf32> -> vector<8x8xf32>
    %c0_57 = arith.constant 0 : index
    %c3 = arith.constant 3 : index
    %91 = vector.load %arg14[%c0_57, %c3] : memref<8x4xf32, #tpu.memory_space<vmem>>, vector<8x1xf32>
    %cst_58 = arith.constant dense<0xFF800000> : vector<8xf32>
    %92 = vector.multi_reduction <maximumf>, %90, %cst_58 [1] : vector<8x8xf32> to vector<8xf32>
    %93 = vector.shape_cast %92 : vector<8xf32> to vector<8x1xf32>
    %94 = arith.maximumf %91, %93 : vector<8x1xf32>
    %95 = arith.subf %91, %94 : vector<8x1xf32>
    %96 = math.exp %95 : vector<8x1xf32>
    %97 = vector.broadcast %94 : vector<8x1xf32> to vector<8x8xf32>
    %98 = arith.subf %90, %97 : vector<8x8xf32>
    %99 = math.exp %98 : vector<8x8xf32>
    %c0_59 = arith.constant 0 : index
    %c3_60 = arith.constant 3 : index
    %100 = vector.load %arg15[%c0_59, %c3_60] : memref<8x4xf32, #tpu.memory_space<vmem>>, vector<8x1xf32>
    %101 = arith.mulf %96, %100 : vector<8x1xf32>
    %cst_61 = arith.constant dense<0.000000e+00> : vector<8xf32>
    %102 = vector.multi_reduction <add>, %99, %cst_61 [1] : vector<8x8xf32> to vector<8xf32>
    %103 = vector.shape_cast %102 : vector<8xf32> to vector<8x1xf32>
    %104 = arith.addf %101, %103 : vector<8x1xf32>
    %c0_62 = arith.constant 0 : index
    %c3_63 = arith.constant 3 : index
    %105 = vector.load %arg15[%c0_62, %c3_63] : memref<8x4xf32, #tpu.memory_space<vmem>>, vector<8x1xf32>
    tpu.vector_store %arg15[%c0_62, %c3_63], %104 {strides = array<i32>} : memref<8x4xf32, #tpu.memory_space<vmem>>, vector<8x1xf32>,
    %c0_64 = arith.constant 0 : index
    %c48_65 = arith.constant 48 : index
    %106 = vector.load %arg16[%c0_64, %c48_65] : memref<8x64xf32, #tpu.memory_space<vmem>>, vector<8x16xf32>
    %107 = vector.broadcast %96 : vector<8x1xf32> to vector<8x16xf32>
    %108 = arith.mulf %107, %106 : vector<8x16xf32>
    %109 = arith.truncf %99 : vector<8x8xf32> to vector<8x8xbf16>
    %110 = vector.extract_strided_slice %6 {offsets = [0, 48], sizes = [8, 16], strides = [1, 1]} : vector<8x64xbf16> to vector<8x16xbf16>
    %cst_66 = arith.constant dense<0.000000e+00> : vector<8x16xf32>
    %111 = tpu.matmul %109, %110, %cst_66 {dimension_numbers = #tpu.dot_dimension_numbers<[1], [0], [0], [1], [0, 0, 1, 1], [], []>} : vector<8x8xbf16>, vector<8x16xbf16>, vector<8x16xf32> -> vector<8x16xf32>
    %112 = arith.addf %108, %111 : vector<8x16xf32>
    %c0_67 = arith.constant 0 : index
    %c48_68 = arith.constant 48 : index
    %113 = vector.load %arg16[%c0_67, %c48_68] : memref<8x64xf32, #tpu.memory_space<vmem>>, vector<8x16xf32>
    tpu.vector_store %arg16[%c0_67, %c48_68], %112 {strides = array<i32>} : memref<8x64xf32, #tpu.memory_space<vmem>>, vector<8x16xf32>,
    %c0_69 = arith.constant 0 : index
    %c3_70 = arith.constant 3 : index
    %114 = vector.load %arg14[%c0_69, %c3_70] : memref<8x4xf32, #tpu.memory_space<vmem>>, vector<8x1xf32>
    tpu.vector_store %arg14[%c0_69, %c3_70], %94 {strides = array<i32>} : memref<8x4xf32, #tpu.memory_space<vmem>>, vector<8x1xf32>,
    %c0_i32_71 = arith.constant 0 : i32
    %115 = arith.cmpi eq, %arg2, %c0_i32_71 : i32
    %116 = arith.extui %115 : i1 to i32
    %c0_i32_72 = arith.constant 0 : i32
    %117 = arith.cmpi ne, %116, %c0_i32_72 : i32
    scf.if %117 {
      %c0_73 = arith.constant 0 : index
      %c0_74 = arith.constant 0 : index
      %118 = vector.load %arg15[%c0_73, %c0_74] : memref<8x4xf32, #tpu.memory_space<vmem>>, vector<8x1xf32>
      %119 = tpu.reciprocal %118 {approx = true} : vector<8x1xf32> -> vector<8x1xf32>
      %c0_75 = arith.constant 0 : index
      %c0_76 = arith.constant 0 : index
      %120 = vector.load %arg16[%c0_75, %c0_76] : memref<8x64xf32, #tpu.memory_space<vmem>>, vector<8x16xf32>
      %121 = vector.broadcast %119 : vector<8x1xf32> to vector<8x16xf32>
      %122 = arith.mulf %120, %121 : vector<8x16xf32>
      %c0_77 = arith.constant 0 : index
      %c0_78 = arith.constant 0 : index
      %123 = vector.load %arg16[%c0_77, %c0_78] : memref<8x64xf32, #tpu.memory_space<vmem>>, vector<8x16xf32>
      tpu.vector_store %arg16[%c0_77, %c0_78], %122 {strides = array<i32>} : memref<8x64xf32, #tpu.memory_space<vmem>>, vector<8x16xf32>,
      %c0_79 = arith.constant 0 : index
      %c1_80 = arith.constant 1 : index
      %124 = vector.load %arg15[%c0_79, %c1_80] : memref<8x4xf32, #tpu.memory_space<vmem>>, vector<8x1xf32>
      %125 = tpu.reciprocal %124 {approx = true} : vector<8x1xf32> -> vector<8x1xf32>
      %c0_81 = arith.constant 0 : index
      %c16_82 = arith.constant 16 : index
      %126 = vector.load %arg16[%c0_81, %c16_82] : memref<8x64xf32, #tpu.memory_space<vmem>>, vector<8x16xf32>
      %127 = vector.broadcast %125 : vector<8x1xf32> to vector<8x16xf32>
      %128 = arith.mulf %126, %127 : vector<8x16xf32>
      %c0_83 = arith.constant 0 : index
      %c16_84 = arith.constant 16 : index
      %129 = vector.load %arg16[%c0_83, %c16_84] : memref<8x64xf32, #tpu.memory_space<vmem>>, vector<8x16xf32>
      tpu.vector_store %arg16[%c0_83, %c16_84], %128 {strides = array<i32>} : memref<8x64xf32, #tpu.memory_space<vmem>>, vector<8x16xf32>,
      %c0_85 = arith.constant 0 : index
      %c2_86 = arith.constant 2 : index
      %130 = vector.load %arg15[%c0_85, %c2_86] : memref<8x4xf32, #tpu.memory_space<vmem>>, vector<8x1xf32>
      %131 = tpu.reciprocal %130 {approx = true} : vector<8x1xf32> -> vector<8x1xf32>
      %c0_87 = arith.constant 0 : index
      %c32_88 = arith.constant 32 : index
      %132 = vector.load %arg16[%c0_87, %c32_88] : memref<8x64xf32, #tpu.memory_space<vmem>>, vector<8x16xf32>
      %133 = vector.broadcast %131 : vector<8x1xf32> to vector<8x16xf32>
      %134 = arith.mulf %132, %133 : vector<8x16xf32>
      %c0_89 = arith.constant 0 : index
      %c32_90 = arith.constant 32 : index
      %135 = vector.load %arg16[%c0_89, %c32_90] : memref<8x64xf32, #tpu.memory_space<vmem>>, vector<8x16xf32>
      tpu.vector_store %arg16[%c0_89, %c32_90], %134 {strides = array<i32>} : memref<8x64xf32, #tpu.memory_space<vmem>>, vector<8x16xf32>,
      %c0_91 = arith.constant 0 : index
      %c3_92 = arith.constant 3 : index
      %136 = vector.load %arg15[%c0_91, %c3_92] : memref<8x4xf32, #tpu.memory_space<vmem>>, vector<8x1xf32>
      %137 = tpu.reciprocal %136 {approx = true} : vector<8x1xf32> -> vector<8x1xf32>
      %c0_93 = arith.constant 0 : index
      %c48_94 = arith.constant 48 : index
      %138 = vector.load %arg16[%c0_93, %c48_94] : memref<8x64xf32, #tpu.memory_space<vmem>>, vector<8x16xf32>
      %139 = vector.broadcast %137 : vector<8x1xf32> to vector<8x16xf32>
      %140 = arith.mulf %138, %139 : vector<8x16xf32>
      %c0_95 = arith.constant 0 : index
      %c48_96 = arith.constant 48 : index
      %141 = vector.load %arg16[%c0_95, %c48_96] : memref<8x64xf32, #tpu.memory_space<vmem>>, vector<8x16xf32>
      tpu.vector_store %arg16[%c0_95, %c48_96], %140 {strides = array<i32>} : memref<8x64xf32, #tpu.memory_space<vmem>>, vector<8x16xf32>,
      %c0_97 = arith.constant 0 : index
      %c0_98 = arith.constant 0 : index
      %142 = vector.load %arg16[%c0_97, %c0_98] : memref<8x64xf32, #tpu.memory_space<vmem>>, vector<8x64xf32>
      %143 = arith.truncf %142 : vector<8x64xf32> to vector<8x64xbf16>
      %c0_99 = arith.constant 0 : index
      %c0_100 = arith.constant 0 : index
      %144 = vector.load %arg8[%c0_99, %c0_100] : memref<64x32xbf16, #tpu.memory_space<vmem>>, vector<64x32xbf16>
      %cst_101 = arith.constant dense<0.000000e+00> : vector<8x32xf32>
      %145 = tpu.matmul %143, %144, %cst_101 {dimension_numbers = #tpu.dot_dimension_numbers<[1], [0], [0], [1], [0, 0, 1, 1], [], []>} : vector<8x64xbf16>, vector<64x32xbf16>, vector<8x32xf32> -> vector<8x32xf32>
      %c0_102 = arith.constant 0 : index
      %c0_103 = arith.constant 0 : index
      %146 = vector.load %arg9[%c0_102, %c0_103] : memref<1x32xf32, #tpu.memory_space<vmem>>, vector<1x32xf32>
      %147 = vector.broadcast %146 : vector<1x32xf32> to vector<8x32xf32>
      %148 = arith.addf %145, %147 : vector<8x32xf32>
      %c0_104 = arith.constant 0 : index
      %c0_105 = arith.constant 0 : index
      %c0_106 = arith.constant 0 : index
      %149 = vector.load %arg3[%c0_104, %c0_105, %c0_106] : memref<1x8x32xf32, #tpu.memory_space<vmem>>, vector<1x8x32xf32>
      %150 = vector.shape_cast %149 : vector<1x8x32xf32> to vector<8x32xf32>
      %151 = arith.addf %148, %150 : vector<8x32xf32>
      %cst_107 = arith.constant dense<0.000000e+00> : vector<8xf32>
      %152 = vector.multi_reduction <add>, %151, %cst_107 [1] : vector<8x32xf32> to vector<8xf32>
      %153 = vector.shape_cast %152 : vector<8xf32> to vector<8x1xf32>
      %cst_108 = arith.constant 3.200000e+01 : f32
      %154 = vector.broadcast %cst_108 : f32 to vector<8x1xf32>
      %155 = arith.divf %153, %154 : vector<8x1xf32>
      %156 = vector.broadcast %155 : vector<8x1xf32> to vector<8x32xf32>
      %157 = arith.subf %151, %156 : vector<8x32xf32>
      %158 = arith.mulf %157, %157 : vector<8x32xf32>
      %cst_109 = arith.constant dense<0.000000e+00> : vector<8xf32>
      %159 = vector.multi_reduction <add>, %158, %cst_109 [1] : vector<8x32xf32> to vector<8xf32>
      %160 = vector.shape_cast %159 : vector<8xf32> to vector<8x1xf32>
      %cst_110 = arith.constant 3.200000e+01 : f32
      %161 = vector.broadcast %cst_110 : f32 to vector<8x1xf32>
      %162 = arith.divf %160, %161 : vector<8x1xf32>
      %163 = vector.broadcast %155 : vector<8x1xf32> to vector<8x32xf32>
      %164 = arith.subf %151, %163 : vector<8x32xf32>
      %cst_111 = arith.constant 9.99999974E-6 : f32
      %165 = vector.broadcast %cst_111 : f32 to vector<8x1xf32>
      %166 = arith.addf %162, %165 : vector<8x1xf32>
      %167 = math.rsqrt %166 : vector<8x1xf32>
      %168 = vector.broadcast %167 : vector<8x1xf32> to vector<8x32xf32>
      %169 = arith.mulf %164, %168 : vector<8x32xf32>
      %c0_112 = arith.constant 0 : index
      %c0_113 = arith.constant 0 : index
      %170 = vector.load %arg10[%c0_112, %c0_113] : memref<1x32xf32, #tpu.memory_space<vmem>>, vector<1x32xf32>
      %171 = vector.broadcast %170 : vector<1x32xf32> to vector<8x32xf32>
      %172 = arith.mulf %169, %171 : vector<8x32xf32>
      %c0_114 = arith.constant 0 : index
      %c0_115 = arith.constant 0 : index
      %173 = vector.load %arg11[%c0_114, %c0_115] : memref<1x32xf32, #tpu.memory_space<vmem>>, vector<1x32xf32>
      %174 = vector.broadcast %173 : vector<1x32xf32> to vector<8x32xf32>
      %175 = arith.addf %172, %174 : vector<8x32xf32>
      %c0_116 = arith.constant 0 : index
      %c0_117 = arith.constant 0 : index
      %c0_118 = arith.constant 0 : index
      %176 = vector.load %arg12[%c0_116, %c0_117, %c0_118] : memref<1x8x32xf32, #tpu.memory_space<vmem>>, vector<1x8x32xf32>
      %177 = vector.shape_cast %176 : vector<1x8x32xf32> to vector<8x32xf32>
      %178 = vector.shape_cast %175 : vector<8x32xf32> to vector<1x8x32xf32>
      tpu.vector_store %arg12[%c0_116, %c0_117, %c0_118], %178 {strides = array<i32>} : memref<1x8x32xf32, #tpu.memory_space<vmem>>, vector<1x8x32xf32>,
    } else {
    }
    return
  }
  func.func @transform_0(%arg0: i32, %arg1: i32, %arg2: i32) -> (i32, i32, i32) {
    %c0_i32 = arith.constant 0 : i32
    %c0_i32_0 = arith.constant 0 : i32
    return %arg0, %arg1, %c0_i32 : i32, i32, i32
  }
  func.func @transform_1(%arg0: i32, %arg1: i32, %arg2: i32) -> (i32, i32) {
    %c0_i32 = arith.constant 0 : i32
    %c0_i32_0 = arith.constant 0 : i32
    %c0_i32_1 = arith.constant 0 : i32
    return %c0_i32, %c0_i32_0 : i32, i32
  }
  func.func @transform_2(%arg0: i32, %arg1: i32, %arg2: i32) -> (i32, i32) {
    %c0_i32 = arith.constant 0 : i32
    %c0_i32_0 = arith.constant 0 : i32
    %c0_i32_1 = arith.constant 0 : i32
    return %c0_i32, %c0_i32_0 : i32, i32
  }
  func.func @transform_3(%arg0: i32, %arg1: i32, %arg2: i32) -> (i32, i32, i32) {
    %c0_i32 = arith.constant 0 : i32
    %c0_i32_0 = arith.constant 0 : i32
    return %arg0, %arg2, %c0_i32 : i32, i32, i32
  }
  func.func @transform_4(%arg0: i32, %arg1: i32, %arg2: i32) -> (i32, i32, i32) {
    %c0_i32 = arith.constant 0 : i32
    %c0_i32_0 = arith.constant 0 : i32
    return %arg0, %arg2, %c0_i32 : i32, i32, i32
  }
  func.func @transform_5(%arg0: i32, %arg1: i32, %arg2: i32) -> (i32, i32) {
    %c0_i32 = arith.constant 0 : i32
    %c0_i32_0 = arith.constant 0 : i32
    %c0_i32_1 = arith.constant 0 : i32
    return %c0_i32, %c0_i32_0 : i32, i32
  }
  func.func @transform_6(%arg0: i32, %arg1: i32, %arg2: i32) -> (i32, i32) {
    %c0_i32 = arith.constant 0 : i32
    %c0_i32_0 = arith.constant 0 : i32
    %c0_i32_1 = arith.constant 0 : i32
    return %c0_i32, %c0_i32_0 : i32, i32
  }
  func.func @transform_7(%arg0: i32, %arg1: i32, %arg2: i32) -> (i32, i32) {
    %c0_i32 = arith.constant 0 : i32
    %c0_i32_0 = arith.constant 0 : i32
    %c0_i32_1 = arith.constant 0 : i32
    return %c0_i32, %c0_i32_0 : i32, i32
  }
  func.func @transform_8(%arg0: i32, %arg1: i32, %arg2: i32) -> (i32, i32) {
    %c0_i32 = arith.constant 0 : i32
    %c0_i32_0 = arith.constant 0 : i32
    %c0_i32_1 = arith.constant 0 : i32
    return %c0_i32, %c0_i32_0 : i32, i32
  }
  func.func @transform_9(%arg0: i32, %arg1: i32, %arg2: i32) -> (i32, i32, i32) {
    %c0_i32 = arith.constant 0 : i32
    %c0_i32_0 = arith.constant 0 : i32
    return %arg0, %arg1, %c0_i32 : i32, i32, i32
  }
}

</mosaic_0001>

<bundles_post_ra>
// kernel: tpu_custom_call.1
= control target key start
LH: loop header
LB: loop body
LE: loop exit
PB: predicated region body
PF: predicated region fallthrough
CT: control target
= control target key end

     0   :  { %s2059_s0 = inlined_call_operand.vmem [shape: f32[2,8,32], index: 0, kind: input, shape index: {}]   ;;  %s2060_s1 = inlined_call_operand.vmem [shape: bf16[32,64], index: 1, kind: input, shape index: {}]   ;;  %s2061_s2 = inlined_call_operand.vmem [shape: f32[1,64], index: 2, kind: input, shape index: {}]   ;;  %s2062_s3 = inlined_call_operand.vmem [shape: bf16[2,8,64], index: 3, kind: input, shape index: {}]   ;;  %s2063_s4 = inlined_call_operand.vmem [shape: bf16[2,8,64], index: 4, kind: input, shape index: {}]   ;;  %s2064_s5 = inlined_call_operand.vmem [shape: bf16[64,32], index: 5, kind: input, shape index: {}]   ;;  %s2065_s6 = inlined_call_operand.vmem [shape: f32[1,32], index: 6, kind: input, shape index: {}]   ;;  %s2066_s7 = inlined_call_operand.vmem [shape: f32[1,32], index: 7, kind: input, shape index: {}]   ;;  %s2067_s8 = inlined_call_operand.vmem [shape: f32[1,32], index: 8, kind: input, shape index: {}]   ;;  %s2068_s9 = inlined_call_operand.hbm [shape: f32[2,8,32], index: 9, kind: output, shape index: {}]  }
   0x1   :  { %2069 = sst [smem:[#allocation9_spill]] %s2059_s0 }
   0x2   :  { %14 = vsyncpa [#allocation7], 0 }
   0x3   :  { %16 = vsyncpa [#allocation7 + $0x1], 0  ;;  %s1730_s30 = smov 0   ;;  %s1732_s10 = smov 0  }
   0x4   :  { %s1734_s11 = smov 0   ;;  %s1736_s12 = smov 0  }
   0x5   :  { %s1738_s13 = smov 0   ;;  %s1740_s14 = smov 0  }
   0x6 LB: > { %s1345_s15 = sadd.s32 4294967295, %s1664_s14   ;;  %s1346_s16 = sadd.s32 4294967294, %s1664_s14   ;;  %s1664_s14 = sphi %s1740_s14, %s22_s14   ;;  %s1660_s13 = sphi %s1738_s13, %s2077_s13   ;;  %s1656_s12 = sphi %s1736_s12, %s2076_s12   ;;  %s1652_s11 = sphi %s1734_s11, %s2075_s11   ;;  %s1648_s10 = sphi %s1732_s10, %s2074_s10   ;;  %s1644_s30 = sphi %s1730_s30, %s2073_s30  }
   0x7   : > { %s41_s17 = sadd.s32 1, %s1660_s13  ;;  %s260_s18 = sadd.s32 1, %s1652_s11 }
   0x8   : > { %p43_p0 = scmp.ge.s32.totalorder %s41_s17, 2  ;;  %p270_p1 = scmp.ne.s32.totalorder %s1652_s11, %s1648_s10 }
   0x9   : > { %p271_p2 = scmp.eq.s32.totalorder %s1345_s15, 1  ;;  %p276_p3 = scmp.ne.s32.totalorder %s1648_s10, %s1644_s30 }
   0xa   : > { %s2079_s17 = smov (%p43_p0, %s41_s17), 0  ;;  %p277_p5 = scmp.eq.s32.totalorder %s1346_s16, 1 }
   0xb   : > { %p1770_p4 = por %p271_p2, %p270_p1  ;;  %s255_s20 = ssub.s32 %s1660_s13, %s2079_s17 }
   0xc   : > { %p1349_p6 = scmp.ge.s32.totalorder %s1664_s14, 1  ;;  %p258_p7 = scmp.eq.s32.totalorder %s255_s20, 0 }
   0xd   : > { %p1777_p8 = por %p277_p5, %p276_p3  ;;  %p343_p9 = scmp.lt.s32.totalorder %s1664_s14, 3 }
   0xe   : > { %s1783_s22 = scalar_select %p258_p7, %s1652_s11, %s260_s18  }
   0xf   : > { %p344_p10 = pnand %p1349_p6, %p343_p9 }
  0x10   : > { %v1556_v0 = vld [vmem:[%s2060_s1] sm:$0xff] (!%p344_p10)   ;;  %v1666_v1 = vmov (!%p344_p10), 0.0   ;;  %v1557_v2 = vld [vmem:[%s2060_s1 + $0x8] sm:$0xff] (!%p344_p10)   ;;  %vm1667_vm0 = vmmov (!%p344_p10), 0   ;;  %p395_p11 = scmp.lt.s32.totalorder (!%p344_p10), %s1656_s12, 1  ;;  %s2072_s0 = sld [smem:[#allocation9_spill]] (!%p344_p10) }
  0x11   : > { %347 = sbr.rel (%p344_p10) target bundleno = 1832 (0x728), region = 56  ;;  %1407 = vmatprep.subr.bf16.mxu0 (!%p344_p10), %v1666_v1  ;;  %1415 = vmatprep.subr.bf16.mxu1 (!%p344_p10), %v1666_v1  ;;  %vm446_vm1 = vcmask (!%p344_p10), 261120   ;;  %vm502_vm2 = vcmask (!%p344_p10), 130048   ;;  %s1668_s25 = smov (!%p344_p10), 112   ;;  %v1354_v8 = vld [vmem:[%s2061_s2] ss:$0 sm:$0xff] (!%p344_p10) }
  0x12   : > { %1408 = vmatpush3.bf16.msra.mxu0 (!%p344_p10), %v1556_v0  ;;  %1411 = vmatprep.mubr.msk.bf16.mxu0 (!%p344_p10), %vm1667_vm0, %v1666_v1  ;;  %s1669_s26 = smov (!%p344_p10), 96   ;;  %vm492_vm3 = vcmask (!%p344_p10), 519168   ;;  %s1670_s15 = smov (!%p344_p10), 80   ;;  %vm550_vm4 = vcmask (!%p344_p10), 64512   ;;  %vm494_vm5 = vcmask (!%p344_p10), 31744   ;;  %v1671_v34 = vmov (!%p344_p10), -inf  }
  0x13   : > { %1409 = vmatprep.subr.bf16.mxu0 (!%p344_p10), %v1666_v1  ;;  %1417 = vmatprep.mubr.msk.bf16.mxu1 (!%p344_p10), %vm1667_vm0, %v1666_v1  ;;  %495 = vst.msk [vmem:[#allocation3] sm:$0xff] (!%p344_p10), %vm494_vm5, %v1671_v34  ;;  %496 = vst.msk [vmem:[#allocation4] sm:$0xff] (!%p344_p10), %vm494_vm5, %v1666_v1  ;;  %v1672_v35 = vmov (!%p344_p10), 0   ;;  %v1673_v51 = vmov (!%p344_p10), 1   ;;  %vm572_vm6 = vcmask (!%p344_p10), 7168   ;;  %v1674_v56 = vmov (!%p344_p10), 2  }
  0x14   : > { %1543 = vset.pattern.permute.xlu1 (!%p344_p10), %v1672_v35  ;;  %1544 = vset.pattern.permute.xlu0 (!%p344_p10), %v1673_v51  ;;  %vm585_vm7 = vcmask (!%p344_p10), 1043456   ;;  %vm711_vm8 = vcmask (!%p344_p10), 15368   ;;  %vm856_vm9 = vcmask (!%p344_p10), 23568   ;;  %vm998_vm10 = vcmask (!%p344_p10), 31768  }
  0x15   : > { %vm497_vm11 = vcmask (!%p344_p10), 523264   ;;  %vm777_vm12 = vcmask (!%p344_p10), 261248   ;;  %vm919_vm13 = vcmask (!%p344_p10), 392448   ;;  %vm1061_vm14 = vcmask (!%p344_p10), 523648  }
  0x16   : > { %1410 = vmatpush3.bf16.msra.mxu0 (!%p344_p10), %v1557_v2  ;;  %498 = vst.msk [vmem:[#allocation5] sm:$0xff] (!%p344_p10), %vm497_vm11, %v1666_v1 }
  0x17   : > { %1421 = vmatprep.subr.bf16.mxu0 (!%p344_p10), %v1666_v1 }
  0x18   : > { %s1800_s27 = scalar_select %p395_p11, %s1656_s12, 1 }
  0x1a   : > { %s1351_s28 = sshll.u32 %s1800_s27, 3  ;;  %s1352_s18 = sshll.u32 %s1800_s27, 2  ;;  %v1868_v52 = vld [vmem:[#allocation3] sm:$0xff] }
  0x1b   : > { %s401_s16 = scalar_lea.vmem %s2072_s0, %s1351_s28  ;;  %s408_s24 = scalar_lea.vmem %s2062_s3, %s1352_s18 }
  0x1c   : > { %v1807_v3 = vld [vmem:[%s401_s16] sm:$0xff]  ;;  %s415_s23 = scalar_lea.vmem %s2063_s4, %s1352_s18  ;;  %s1676_s27 = smov 16  }
  0x1d   : > { %v422_v4 = vpack.c.bf16 %v1807_v3, %v1807_v3  ;;  %v499_v5 = vld [vmem:[%s408_s24] sm:$0xf]  ;;  %s1677_s18 = smov 32   ;;  %s1678_s24 = smov 48  }
  0x1e   : > { %v1361_v6 = vcombine.low %v499_v5, %v499_v5  ;;  %v507_v7 = vsel %vm502_vm2, %v499_v5, 0  ;;  %v500_v57 = vld [vmem:[%s415_s23] sm:$0xf]  ;;  %s1380_s16 = sshll.u32 %s1656_s12, 7  ;;  %s1679_s12 = smov [#allocation6]  }
  0x1f   : > { %1412 = vmatmul.mubr.msk.bf16.vlgmr.msra.gmra.mrb[0].mxu0 %vm446_vm1, %v422_v4  ;;  %1416 = vmatpush3.bf16.xpose.msra.mxu1 %v507_v7  ;;  %v587_v58 = vsel %vm585_vm7, %v500_v57, 0  ;;  %s2011_s0 = scalar_lea.hbm %s2068_s9, %s1380_s16 }
  0x20   : > { %1423 = vmatprep.mubr.msk.bf16.mxu0 %vm1667_vm0, %v1666_v1  ;;  %641 = vrot.lane.b32.xlu0 %v1361_v6, %s1668_s25 }
  0x21   : > { %786 = vrot.lane.b32.xlu1 %v1361_v6, %s1669_s26  ;;  %1427 = vmatprep.subr.bf16.mxu1 %v1666_v1 }
  0x22   : > { %1422 = vmatpush3.bf16.msra.mxu0 %v587_v58 }
  0x23   : > { %1433 = vmatprep.subr.bf16.mxu0 %v1666_v1 }
  0x92   : > { %v642_v16 = vpop.permute.xlu0 %641 }
  0x93   : > { %v647_v17 = vsel %vm502_vm2, %v642_v16, 0  ;;  %v787_v22 = vpop.permute.xlu1 %786 }
  0x94   : > { %v792_v23 = vsel %vm502_vm2, %v787_v22, 0 }
  0xf2   : > { %v484_v9 = vpop.f32.mrb[0].mxu0 }
  0xf3   : > { %v485_v10 = vadd.f32 %v1354_v8, %v484_v9  ;;  %v1413_v11 = vpop.f32.mrb[1].mxu0  ;;  %v1675_v9 = vmov 3  }
  0xf4   : > { %v487_v12 = vpop.f32.mrb[2].mxu0 }
  0xf5   : > { %v490_v13 = vmul.f32 0.25, %v485_v10  ;;  %v1414_v14 = vpop.f32.mrb[3].mxu0 }
  0xf7   : > { %v491_v15 = vpack.c.bf16 %v490_v13, %v490_v13 }
  0xf9   : > { %493 = vst.msk [vmem:[#allocation2] sm:$0xf] %vm492_vm3, %v491_v15 }
 0x100   : > { %v501_v18 = vld [vmem:[#allocation2] sm:$0xf] }
 0x101   : > { %v1559_v19 = vld [vmem:[#allocation2] ss:$0 sps:$4 sm:$0xff]   ;;  %1418 = vmatmul.mubr.msk.bf16.vlgmr.msra.gmra.mrb[0].mxu1 %vm502_vm2, %v501_v18 }
 0x102   : > { %v1560_v20 = vld [vmem:[#allocation2] ss:$0 sps:$4 sm:$0xff]   ;;  %784 = vrot.lane.b32.xlu1 %v1559_v19, %s1669_s26  ;;  %1428 = vmatpush3.bf16.xpose.msra.mxu1 %v647_v17 }
 0x103   : > { %636 = vrot.lane.b32.xlu0 %v1560_v20, %s1668_s25  ;;  %1429 = vmatprep.mubr.msk.bf16.mxu1 %vm1667_vm0, %v1666_v1  ;;  %v1561_v21 = vld [vmem:[#allocation2] ss:$0 sps:$4 sm:$0xff]  }
 0x104   : > { %1439 = vmatprep.subr.bf16.mxu1 %v1666_v1 }
 0x106   : > { %926 = vrot.lane.b32.xlu1 %v1561_v21, %s1670_s15 }
 0x107   : > { %928 = vrot.lane.b32.xlu0 %v1361_v6, %s1670_s15  ;;  %v1363_v6 = vcombine.low %v500_v57, %v500_v57 }
 0x174   : > { %v785_v27 = vpop.permute.xlu1 %784 }
 0x175   : > { %v637_v24 = vpop.permute.xlu0 %636 }
 0x176   : > { %1430 = vmatmul.mubr.msk.bf16.vlgmr.msra.gmra.mrb[4].mxu1 %vm502_vm2, %v637_v24 }
 0x177   : > { %1440 = vmatpush3.bf16.xpose.msra.mxu1 %v792_v23  ;;  %1441 = vmatprep.mubr.msk.bf16.mxu1 %vm1667_vm0, %v1666_v1 }
 0x178   : > { %1451 = vmatprep.subr.bf16.mxu1 %v1666_v1  ;;  %v927_v28 = vpop.permute.xlu1 %926 }
 0x179   : > { %v929_v25 = vpop.permute.xlu0 %928 }
 0x17a   : > { %v934_v26 = vsel %vm502_vm2, %v929_v25, 0 }
 0x17e   : > { %1442 = vmatmul.mubr.msk.bf16.vlgmr.msra.gmra.mrb[8].mxu1 %vm502_vm2, %v785_v27 }
 0x17f   : > { %1452 = vmatpush3.bf16.xpose.msra.mxu1 %v934_v26  ;;  %1453 = vmatprep.mubr.msk.bf16.mxu1 %vm1667_vm0, %v1666_v1 }
 0x180   : > { %1463 = vmatprep.subr.bf16.mxu1 %v1666_v1 }
 0x186   : > { %1454 = vmatmul.mubr.msk.bf16.vlgmr.msra.gmra.mrb[12].mxu1 %vm502_vm2, %v927_v28 }
 0x187   : > { %1471 = vmatprep.mubr.msk.bf16.mxu1 %vm1667_vm0, %v1666_v1 }
 0x1d4   : > { %v1849_v29 = vpop.f32.mrb[0].mxu1 }
 0x1d5   : > { %v1419_v30 = vpop.f32.mrb[1].mxu1  ;;  %v551_v31 = vsel %vm550_vm4, %v1849_v29, -inf }
 0x1d6   : > { %552 = vmax.xlane.f32.xlu0 %v551_v31  ;;  %v546_v32 = vpop.f32.mrb[2].mxu1 }
 0x1d7   : > { %v1420_v33 = vpop.f32.mrb[3].mxu1 }
 0x249   : > { %v1855_v36 = vpop.f32.mrb[4].mxu1 }
 0x24a   : > { %v1431_v37 = vpop.f32.mrb[5].mxu1  ;;  %v690_v38 = vsel %vm550_vm4, %v1855_v36, -inf }
 0x24b   : > { %691 = vmax.xlane.f32.xlu1 %v690_v38  ;;  %v686_v39 = vpop.f32.mrb[6].mxu1 }
 0x24c   : > { %v1432_v40 = vpop.f32.mrb[7].mxu1 }
 0x251   : > { %v1859_v41 = vpop.f32.mrb[8].mxu1 }
 0x252   : > { %v1443_v42 = vpop.f32.mrb[9].mxu1  ;;  %v835_v43 = vsel %vm550_vm4, %v1859_v41, -inf }
 0x253   : > { %836 = vmax.xlane.f32.xlu0 %v835_v43  ;;  %v831_v44 = vpop.f32.mrb[10].mxu1 }
 0x254   : > { %v1444_v45 = vpop.f32.mrb[11].mxu1 }
 0x259   : > { %v1863_v46 = vpop.f32.mrb[12].mxu1 }
 0x25a   : > { %v1455_v47 = vpop.f32.mrb[13].mxu1  ;;  %v977_v48 = vsel %vm550_vm4, %v1863_v46, -inf }
 0x25b   : > { %978 = vmax.xlane.f32.xlu0 %v977_v48  ;;  %v973_v49 = vpop.f32.mrb[14].mxu1 }
 0x25c   : > { %v1456_v50 = vpop.f32.mrb[15].mxu1 }
 0x263   : > { %v553_v53 = vpop.xlane.xlu0 %552 }
 0x264   : > { %v1871_v54 = vmax.f32 %v1868_v52, %v553_v53 }
 0x266   : > { %v555_v55 = vsub.f32 %v1868_v52, %v1871_v54  ;;  %631 = vst.msk [vmem:[#allocation3] sm:$0xff] %vm572_vm6, %v1871_v54  ;;  %560 = vperm.xlu1 %1543, %v1871_v54  }
 0x268   : > { %v556_v31 = vmul.f32 1.442695, %v555_v55 }
 0x26a   : > { %1545 = vset.pattern.permute.xlu1 %v1674_v56 }
 0x26d   : > { %v1886_v59 = vld [vmem:[#allocation3] sm:$0xff] }
 0x2d8   : > { %v692_v60 = vpop.xlane.xlu1 %691 }
 0x2d9   : > { %v1889_v61 = vmax.f32 %v1886_v59, %v692_v60  ;;  %v574_v60 = vld [vmem:[#allocation5] sm:$0xff] }
 0x2db   : > { %v694_v62 = vsub.f32 %v1886_v59, %v1889_v61  ;;  %779 = vst.msk [vmem:[#allocation3] sm:$0xff] %vm711_vm8, %v1889_v61  ;;  %699 = vperm.xlu0 %1544, %v1889_v61  }
 0x2dd   : > { %v695_v44 = vmul.f32 1.442695, %v694_v62 }
 0x2df   : > { %1547 = vset.pattern.permute.xlu0 %v1672_v35 }
 0x2e0   : > { %v837_v0 = vpop.xlane.xlu0 %836 }
 0x2e2   : > { %v1897_v63 = vld [vmem:[#allocation3] sm:$0xff] }
 0x2e3   : > { %v1900_v2 = vmax.f32 %v1897_v63, %v837_v0 }
 0x2e5   : > { %v839_v4 = vsub.f32 %v1897_v63, %v1900_v2  ;;  %921 = vst.msk [vmem:[#allocation3] sm:$0xff] %vm856_vm9, %v1900_v2  ;;  %v561_v5 = vpop.permute.xlu1 %560  ;;  %844 = vperm.xlu1 %1545, %v1900_v2  }
 0x2e6   : > { %v563_v7 = vsub.f32 %v1849_v29, %v561_v5 }
 0x2e7   : > { %v840_v55 = vmul.f32 1.442695, %v839_v4 }
 0x2e8   : > { %v564_v8 = vmul.f32 1.442695, %v563_v7  ;;  %v979_v11 = vpop.xlane.xlu0 %978 }
 0x2e9   : > { %724 = vrot.lane.b32.xlu1 %v1363_v6, %s1668_s25 }
 0x2ea   : > { %1566 = vpow2.f32 %v564_v8  ;;  %1546 = vset.pattern.permute.xlu1 %v1675_v9 }
 0x2ec   : > { %v1910_v10 = vld [vmem:[#allocation3] sm:$0xff] }
 0x2ed   : > { %v1913_v12 = vmax.f32 %v1910_v10, %v979_v11 }
 0x2ef   : > { %v981_v13 = vsub.f32 %v1910_v10, %v1913_v12  ;;  %1063 = vst.msk [vmem:[#allocation3] sm:$0xff] %vm998_vm10, %v1913_v12  ;;  %986 = vperm.xlu1 %1546, %v1913_v12  }
 0x2f1   : > { %v982_v61 = vmul.f32 1.442695, %v981_v13 }
 0x2f3   : > { %866 = vrot.lane.b32.xlu1 %v1363_v6, %s1669_s26 }
 0x2f4   : > { %v1567_v14 = vpop.eup %1566  ;;  %1548 = vset.pattern.permute.xlu1 %v1673_v51 }
 0x2f5   : > { %v581_v15 = vpack.c.bf16 %v1567_v14, %v1567_v14  ;;  %v568_v16 = vsel %vm550_vm4, %v1567_v14, 0.0 }
 0x2f7   : > { %1424 = vmatmul.mubr.msk.bf16.vlgmr.msra.gmra.mrb[4].mxu0 %vm550_vm4, %v581_v15  ;;  %1008 = vrot.lane.b32.xlu1 %v1363_v6, %s1670_s15 }
 0x2f8   : > { %1435 = vmatprep.mubr.msk.bf16.mxu0 %vm1667_vm0, %v1666_v1 }
 0x31b   : > { %569 = vadd.xlane.f32.xlu1 %v568_v16 }
 0x35a   : > { %v700_v17 = vpop.permute.xlu0 %699 }
 0x35b   : > { %v702_v18 = vsub.f32 %v1855_v36, %v700_v17 }
 0x35d   : > { %v703_v19 = vmul.f32 1.442695, %v702_v18 }
 0x35f   : > { %1568 = vpow2.f32 %v703_v19 }
 0x364   : > { %v845_v20 = vpop.permute.xlu1 %844 }
 0x365   : > { %v847_v21 = vsub.f32 %v1859_v41, %v845_v20 }
 0x367   : > { %v848_v22 = vmul.f32 1.442695, %v847_v21 }
 0x368   : > { %v725_v23 = vpop.permute.xlu1 %724 }
 0x369   : > { %v1569_v24 = vpop.eup %1568  ;;  %1570 = vpow2.f32 %v848_v22  ;;  %v730_v25 = vsel %vm585_vm7, %v725_v23, 0 }
 0x36a   : > { %1434 = vmatpush3.bf16.msra.mxu0 %v730_v25  ;;  %v707_v26 = vsel %vm550_vm4, %v1569_v24, 0.0  ;;  %v720_v27 = vpack.c.bf16 %v1569_v24, %v1569_v24 }
 0x36b   : > { %708 = vadd.xlane.f32.xlu0 %v707_v26  ;;  %1445 = vmatprep.subr.bf16.mxu0 %v1666_v1 }
 0x36d   : > { %1436 = vmatmul.mubr.msk.bf16.vlgmr.msra.gmra.mrb[8].mxu0 %vm550_vm4, %v720_v27 }
 0x36e   : > { %v987_v28 = vpop.permute.xlu1 %986  ;;  %1447 = vmatprep.mubr.msk.bf16.mxu0 %vm1667_vm0, %v1666_v1 }
 0x36f   : > { %v989_v29 = vsub.f32 %v1863_v46, %v987_v28  ;;  %v566_v46 = vld [vmem:[#allocation4] sm:$0xff]  ;;  %v1562_v28 = vld [vmem:[%s2064_s5] sm:$0xff]  }
 0x370   : > { %1464 = vmatpush3.bf16.msra.mxu1 %v1562_v28 }
 0x371   : > { %v990_v30 = vmul.f32 1.442695, %v989_v29  ;;  %1465 = vmatprep.subr.bf16.mxu1 %v1666_v1 }
 0x372   : > { %v867_v32 = vpop.permute.xlu1 %866 }
 0x373   : > { %v1571_v33 = vpop.eup %1570  ;;  %1572 = vpow2.f32 %v990_v30  ;;  %v872_v34 = vsel %vm585_vm7, %v867_v32, 0 }
 0x374   : > { %1446 = vmatpush3.bf16.msra.mxu0 %v872_v34  ;;  %v852_v36 = vsel %vm550_vm4, %v1571_v33, 0.0  ;;  %v865_v37 = vpack.c.bf16 %v1571_v33, %v1571_v33  ;;  %1574 = vpow2.f32 %v556_v31 }
 0x375   : > { %853 = vadd.xlane.f32.xlu1 %v852_v36  ;;  %1457 = vmatprep.subr.bf16.mxu0 %v1666_v1  ;;  %1576 = vpow2.f32 %v695_v44 }
 0x376   : > { %v1009_v38 = vpop.permute.xlu1 %1008  ;;  %1578 = vpow2.f32 %v840_v55 }
 0x377   : > { %1448 = vmatmul.mubr.msk.bf16.vlgmr.msra.gmra.mrb[12].mxu0 %vm550_vm4, %v865_v37  ;;  %v1014_v39 = vsel %vm585_vm7, %v1009_v38, 0  ;;  %1580 = vpow2.f32 %v982_v61 }
 0x378   : > { %1458 = vmatpush3.bf16.msra.mxu0 %v1014_v39  ;;  %1459 = vmatprep.mubr.msk.bf16.mxu0 %vm1667_vm0, %v1666_v1 }
 0x37d   : > { %v1573_v40 = vpop.eup %1572 }
 0x37e   : > { %v994_v41 = vsel %vm550_vm4, %v1573_v40, 0.0  ;;  %v1007_v42 = vpack.c.bf16 %v1573_v40, %v1573_v40  ;;  %v1575_v43 = vpop.eup %1574 }
 0x37f   : > { %995 = vadd.xlane.f32.xlu1 %v994_v41  ;;  %v1577_v45 = vpop.eup %1576  ;;  %v567_v47 = vmul.f32 %v1575_v43, %v566_v46 }
 0x380   : > { %1460 = vmatmul.mubr.msk.bf16.vlgmr.msra.gmra.mrb[16].mxu0 %vm550_vm4, %v1007_v42  ;;  %v1579_v5 = vpop.eup %1578 }
 0x381   : > { %577 = vperm.xlu0 %1547, %v1575_v43   ;;  %v1581_v4 = vpop.eup %1580 }
 0x385   : > { %1552 = vset.pattern.permute.xlu0 %v1673_v51 }
 0x390   : > { %716 = vperm.xlu1 %1548, %v1577_v45  }
 0x394   : > { %1549 = vset.pattern.permute.xlu1 %v1674_v56 }
 0x3a8   : > { %v570_v48 = vpop.xlane.xlu1 %569 }
 0x3a9   : > { %v571_v49 = vadd.f32 %v570_v48, %v567_v47 }
 0x3ab   : > { %573 = vst.msk [vmem:[#allocation4] sm:$0xff] %vm572_vm6, %v571_v49 }
 0x3b2   : > { %v705_v57 = vld [vmem:[#allocation4] sm:$0xff] }
 0x3b3   : > { %v706_v51 = vmul.f32 %v1577_v45, %v705_v57 }
 0x3ca   : > { %v623_v50 = vpop.f32.mrb[4].mxu0 }
 0x3cb   : > { %v1425_v52 = vpop.f32.mrb[5].mxu0 }
 0x3cc   : > { %v626_v53 = vpop.f32.mrb[6].mxu0 }
 0x3cd   : > { %v1426_v54 = vpop.f32.mrb[7].mxu0 }
 0x3f8   : > { %v709_v58 = vpop.xlane.xlu0 %708 }
 0x3f9   : > { %v710_v59 = vadd.f32 %v709_v58, %v706_v51 }
 0x3fb   : > { %712 = vst.msk [vmem:[#allocation4] sm:$0xff] %vm711_vm8, %v710_v59  ;;  %v1371_v59 = vld [vmem:[%s2065_s6] ss:$0 sm:$0xff] }
 0x400   : > { %v578_v62 = vpop.permute.xlu0 %577 }
 0x401   : > { %v580_v0 = vmul.f32 %v578_v62, %v574_v60 }
 0x402   : > { %v850_v6 = vld [vmem:[#allocation4] sm:$0xff]  ;;  %v854_v63 = vpop.xlane.xlu1 %853 }
 0x403   : > { %v629_v7 = vadd.f32 %v623_v50, %v580_v0  ;;  %v851_v8 = vmul.f32 %v1579_v5, %v850_v6 }
 0x405   : > { %630 = vst.msk [vmem:[#allocation5] sm:$0xff] %vm502_vm2, %v629_v7  ;;  %v855_v2 = vadd.f32 %v854_v63, %v851_v8 }
 0x407   : > { %857 = vst.msk [vmem:[#allocation4] sm:$0xff] %vm856_vm9, %v855_v2 }
 0x40c   : > { %v996_v15 = vpop.xlane.xlu1 %995  ;;  %v713_v30 = vld [vmem:[#allocation5] sm:$0xff] }
 0x40e   : > { %v992_v11 = vld [vmem:[#allocation4] sm:$0xff] }
 0x40f   : > { %v993_v14 = vmul.f32 %v1581_v4, %v992_v11 }
 0x410   : > { %v717_v29 = vpop.permute.xlu1 %716 }
 0x411   : > { %v997_v16 = vadd.f32 %v996_v15, %v993_v14  ;;  %v719_v31 = vmul.f32 %v717_v29, %v713_v30 }
 0x413   : > { %999 = vst.msk [vmem:[#allocation4] sm:$0xff] %vm998_vm10, %v997_v16 }
 0x41a   : > { %v1077_v10 = vld [vmem:[#allocation4] sm:$0xff] }
 0x41b   : > { %1582 = vrcp.f32 %v1077_v10 }
 0x425   : > { %v1583_v12 = vpop.eup %1582 }
 0x426   : > { %1082 = vperm.xlu0 %1552, %v1583_v12  }
 0x42a   : > { %1555 = vset.pattern.permute.xlu0 %v1675_v9 }
 0x440   : > { %v766_v13 = vpop.f32.mrb[8].mxu0 }
 0x441   : > { %773 = vrot.lane.b32.xlu1 %v766_v13, %s1676_s27  ;;  %v1437_v17 = vpop.f32.mrb[9].mxu0  ;;  %v1378_v13 = vld [vmem:[%s2067_s8] ss:$0 sm:$0xff] }
 0x442   : > { %v769_v18 = vpop.f32.mrb[10].mxu0 }
 0x443   : > { %v1438_v19 = vpop.f32.mrb[11].mxu0 }
 0x445   : > { %861 = vperm.xlu1 %1549, %v1579_v5  }
 0x449   : > { %1550 = vset.pattern.permute.xlu1 %v1675_v9 }
 0x44a   : > { %v908_v20 = vpop.f32.mrb[12].mxu0 }
 0x44b   : > { %915 = vrot.lane.b32.xlu1 %v908_v20, %s1677_s18  ;;  %v1449_v21 = vpop.f32.mrb[13].mxu0 }
 0x44c   : > { %v911_v22 = vpop.f32.mrb[14].mxu0 }
 0x44d   : > { %v1450_v23 = vpop.f32.mrb[15].mxu0 }
 0x44f   : > { %1003 = vperm.xlu1 %1550, %v1581_v4  }
 0x453   : > { %v1050_v24 = vpop.f32.mrb[16].mxu0  ;;  %1551 = vset.pattern.permute.xlu1 %v1672_v35  ;;  %v1563_v35 = vld [vmem:[%s2064_s5 + $0x8] sm:$0xff]  }
 0x454   : > { %1057 = vrot.lane.b32.xlu1 %v1050_v24, %s1678_s24  ;;  %v1461_v25 = vpop.f32.mrb[17].mxu0  ;;  %1466 = vmatpush3.bf16.msra.mxu1 %v1563_v35  ;;  %s392_s24 = sand.u32 1, %s1648_s10  }
 0x455   : > { %v1053_v26 = vpop.f32.mrb[18].mxu0  ;;  %1467 = vmatprep.subr.bf16.mxu1 %v1666_v1  ;;  %s1350_s25 = sshll.u32 %s392_s24, 3  ;;  %s1227_s26 = scalar_lea.sflag [#allocation7], %s392_s24 }
 0x456   : > { %v1462_v27 = vpop.f32.mrb[19].mxu0  ;;  %s394_s20 = scalar_lea.vmem [#allocation6], %s1350_s25  ;;  %s1590_s25 = sshll.u32 %s1679_s12, 4  ;;  %s1591_s25 = int_to_ptr.vmem [resolvable:$false] %s1590_s25 }
 0x457   : > { %s1241_s23 = sshll.u32 %s394_s20, 4  ;;  %s1592_s29 = scalar_lea.vmem %s1591_s25, 256  ;;  %s2013_s23 = int_to_ptr.vmem [resolvable:$true] %s1241_s23 }
 0x458   : > { %1072 = vperm.xlu1 %1551, %v1583_v12   ;;  %s1586_s28 = scalar_lea.vmem %s2013_s23, 128  ;;  %p1593_p1 = scmp.lt.s32.totalorder %s2013_s23, %s1591_s25 }
 0x459   : > { %p1587_p12 = scmp.ne.s32.totalorder %s2013_s23, %s1586_s28  ;;  %p1594_p2 = scmp.lt.s32.totalorder %s1592_s29, %s1586_s28 }
 0x45b   : > { %p1588_p13 = pnand %p1587_p12, %p1770_p4  ;;  %p1595_p3 = por %p1594_p2, %p1593_p1 }
 0x45c   : > { %1553 = vset.pattern.permute.xlu1 %v1674_v56  ;;  %v1564_v56 = vld [vmem:[%s2064_s5 + $0x10] sm:$0xff]  }
 0x45d   : > { %1092 = vperm.xlu1 %1553, %v1583_v12   ;;  %1468 = vmatpush3.bf16.msra.mxu1 %v1564_v56  ;;  %p1589_p0 = pneg %p1588_p13 }
 0x45e   : > { %1469 = vmatprep.subr.bf16.mxu1 %v1666_v1 }
 0x45f   : > { %p1596_p5 = pnand %p1595_p3, %p1589_p0 }
 0x461   : > { %1554 = vset.pattern.permute.xlu1 %v1675_v9  ;;  %v1565_v9 = vld [vmem:[%s2064_s5 + $0x18] sm:$0xff]  }
 0x462   : > { %1102 = vperm.xlu1 %1554, %v1583_v12   ;;  %1470 = vmatpush3.bf16.msra.mxu1 %v1565_v9 }
 0x4a5   : > { %v1083_v47 = vpop.permute.xlu0 %1082 }
 0x4b3   : > { %v774_v32 = vpop.permute.xlu1 %773 }
 0x4b4   : > { %v776_v33 = vadd.f32 %v774_v32, %v719_v31 }
 0x4b6   : > { %778 = vst.msk [vmem:[#allocation5] sm:$0xff] %vm777_vm12, %v776_v33 }
 0x4bd   : > { %v858_v36 = vld [vmem:[#allocation5] sm:$0xff] }
 0x4c4   : > { %v862_v34 = vpop.permute.xlu1 %861 }
 0x4c5   : > { %v864_v37 = vmul.f32 %v862_v34, %v858_v36 }
 0x4c8   : > { %v916_v38 = vpop.permute.xlu1 %915 }
 0x4c9   : > { %v918_v39 = vadd.f32 %v916_v38, %v864_v37 }
 0x4cb   : > { %920 = vst.msk [vmem:[#allocation5] sm:$0xff] %vm919_vm13, %v918_v39 }
 0x4ce   : > { %v1004_v40 = vpop.permute.xlu1 %1003 }
 0x4d2   : > { %v1000_v41 = vld [vmem:[#allocation5] sm:$0xff]  ;;  %v1058_v42 = vpop.permute.xlu1 %1057 }
 0x4d3   : > { %v1006_v1 = vmul.f32 %v1004_v40, %v1000_v41 }
 0x4d5   : > { %v1060_v43 = vadd.f32 %v1058_v42, %v1006_v1 }
 0x4d7   : > { %1062 = vst.msk [vmem:[#allocation5] sm:$0xff] %vm1061_vm14, %v1060_v43  ;;  %v1073_v45 = vpop.permute.xlu1 %1072 }
 0x4dc   : > { %v1093_v52 = vpop.permute.xlu1 %1092 }
 0x4de   : > { %v1069_v44 = vld [vmem:[#allocation5] sm:$0xff] }
 0x4df   : > { %v1075_v46 = vmul.f32 %v1073_v45, %v1069_v44 }
 0x4e1   : > { %1076 = vst.msk [vmem:[#allocation5] sm:$0xff] %vm502_vm2, %v1075_v46  ;;  %v1103_v55 = vpop.permute.xlu1 %1102 }
 0x4e8   : > { %v1079_v48 = vld [vmem:[#allocation5] sm:$0xff] }
 0x4e9   : > { %v1085_v49 = vmul.f32 %v1083_v47, %v1079_v48 }
 0x4eb   : > { %1086 = vst.msk [vmem:[#allocation5] sm:$0xff] %vm777_vm12, %v1085_v49 }
 0x4f2   : > { %v1089_v50 = vld [vmem:[#allocation5] sm:$0xff] }
 0x4f3   : > { %v1095_v53 = vmul.f32 %v1093_v52, %v1089_v50 }
 0x4f5   : > { %1096 = vst.msk [vmem:[#allocation5] sm:$0xff] %vm919_vm13, %v1095_v53 }
 0x4fc   : > { %v1099_v54 = vld [vmem:[#allocation5] sm:$0xff] }
 0x4fd   : > { %v1105_v57 = vmul.f32 %v1103_v55, %v1099_v54 }
 0x4ff   : > { %1106 = vst.msk [vmem:[#allocation5] sm:$0xff] %vm1061_vm14, %v1105_v57 }
 0x506   : > { %v1107_v51 = vld [vmem:[#allocation5] sm:$0xff] }
 0x507   : > { %v1108_v58 = vpack.c.bf16 %v1107_v51, %v1107_v51 }
 0x509   : > { %1472 = vmatmul.mubr.msk.bf16.vlgmr.msra.gmra.mrb[16].mxu1 %vm497_vm11, %v1108_v58 }
 0x5dc   : > { %v1186_v60 = vpop.f32.mrb[16].mxu1 }
 0x5dd   : > { %v1187_v61 = vadd.f32 %v1371_v59, %v1186_v60  ;;  %v1473_v62 = vpop.f32.mrb[17].mxu1 }
 0x5de   : > { %v1189_v0 = vpop.f32.mrb[18].mxu1 }
 0x5df   : > { %v1474_v5 = vpop.f32.mrb[19].mxu1  ;;  %v1193_v6 = vadd.f32 %v1187_v61, %v1807_v3  ;;  %v1377_v3 = vld [vmem:[%s2066_s7] ss:$0 sm:$0xff] }
 0x5e1   : > { %v1195_v7 = vsel %vm446_vm1, %v1193_v6, 0.0 }
 0x5e2   : > { %1196 = vadd.xlane.f32.xlu0 %v1195_v7 }
 0x66f   : > { %v1197_v8 = vpop.xlane.xlu0 %1196 }
 0x670   : > { %v1199_v63 = vmul.f32 0.03125, %v1197_v8 }
 0x672   : > { %v1200_v2 = vsub.f32 %v1193_v6, %v1199_v63 }
 0x674   : > { %v1201_v4 = vmul.f32 %v1200_v2, %v1200_v2 }
 0x676   : > { %v1202_v11 = vsel %vm446_vm1, %v1201_v4, 0.0 }
 0x677   : > { %1203 = vadd.xlane.f32.xlu1 %v1202_v11 }
 0x704   : > { %v1204_v14 = vpop.xlane.xlu1 %1203 }
 0x705   : > { %v1205_v15 = vmul.f32 0.03125, %v1204_v14 }
 0x707   : > { %v1206_v16 = vadd.f32 1e-05, %v1205_v15 }
 0x709   : > { %1584 = vrsqrt.f32 %v1206_v16 }
 0x713   : > { %v1585_v10 = vpop.eup %1584 }
 0x714   : > { %v1208_v12 = vmul.f32 %v1585_v10, %v1200_v2 }
 0x716   : > { %v1216_v17 = vmul.f32 %v1377_v3, %v1208_v12 }
 0x718   : > { %v1224_v18 = vadd.f32 %v1378_v13, %v1216_v17 }
 0x71a   : > { %1225 = vst.msk [vmem:[%s394_s20] sm:$0xff] %vm446_vm1, %v1224_v18 }
 0x71b   : > { %1599 = shalt.err (!%p1596_p5)
}
 0x71c   : > { %s1600_s24 = scalar_lea.hbm %s2011_s0, 128  ;;  %s1604_s20 = scalar_lea.hbm %s2068_s9, 256 }
 0x71d   : > { %p1601_p6 = scmp.ne.s32.totalorder %s2011_s0, %s1600_s24  ;;  %p1605_p10 = scmp.lt.u32.totalorder %s2011_s0, %s2068_s9 }
 0x71e   : > { %p1606_p11 = scmp.lt.u32.totalorder %s1604_s20, %s1600_s24  ;;  %p1608_p13 = scmp.lt.u32.totalorder %s1600_s24, %s2011_s0 }
 0x71f   : > { %p1602_p7 = pnand %p1601_p6, %p1770_p4 }
 0x720   : > { %p1607_p12 = por %p1606_p11, %p1605_p10 }
 0x721   : > { %p1603_p9 = pneg %p1602_p7 }
 0x722   : > { %p1609_p0 = por %p1608_p13, %p1607_p12 }
 0x724   : > { %p1610_p1 = pnand %p1609_p0, %p1603_p9 }
 0x726   : > { %1613 = shalt.err (!%p1610_p1)
}
 0x727   : > { %1475 = dma.vmem_to_hbm [thread:$0]  (%p1770_p4), %s2013_s23, 128, %s2011_s0, %s1227_s26  }
 0x728 PF: > { %p1481_p2 = scmp.ge.s32.totalorder %s1664_s14, 2  ;;  %s1253_s28 = sand.u32 1, %s1644_s30  }
 0x729   : > { %s1254_s12 = scalar_lea.sflag [#allocation7], %s1253_s28 }
 0x72a   : > { %p1478_p3 = pnand %p1481_p2, %p1777_p8 }
 0x72c   : > { %1639 = dma.done.wait (!%p1478_p3), %s1254_s12, 128  }
 0x72d   : > { %1641 = vsyncadd (!%p1478_p3), %s1254_s12, 4294967168  ;;  %s22_s14 = sadd.s32 1, %s1664_s14   ;;  %s2073_s30 = smov %s1648_s10 }
 0x72e   : > { %p19_p5 = scmp.ge.s32.totalorder %s22_s14, 4   ;;  %s2074_s10 = smov %s1652_s11 }
 0x72f   : > { %s2075_s11 = smov %s1783_s22  ;;  %s2076_s12 = smov %s1660_s13 }
 0x730   : > { %s2077_s13 = smov %s2079_s17  ;;  %21 = sbr.rel (!%p19_p5) target bundleno = 6 (0x6), region = 105 }
 0x737   :  { %1259 = vsyncpa [#allocation7], 1 }
 0x738   :  { %1261 = vsyncpa [#allocation7 + $0x1], 1 }

</bundles_post_ra>
